<compile_context>
chip_gen: v6e
topology: v6e:2x2x1
jax: 0.10.0
libtpu: 0.0.40
codegen_flags: <defaults>
</compile_context>

<pallas_src>
import math

import jax
import jax.numpy as jnp
from jax.experimental import pallas as pl
from jax.experimental.pallas import tpu as pltpu


def sage_gcn_kernel(x_ref, w_ref, o_ref):
    # Single fused matmul: [src | flat_neighbors] @ [W_self ; W_agg/K tiled]
    # bf16 operands, f32 accumulate on the MXU.
    hidden = jnp.dot(x_ref[...], w_ref[...],
                     preferred_element_type=jnp.float32)        # (TN, H) f32
    # leaky_relu (PyTorch default negative_slope = 0.01), f32 epilogue.
    o_ref[...] = jnp.where(hidden > 0, hidden, 0.01 * hidden).astype(o_ref.dtype)


def _round_up(x, m):
    return -(-x // m) * m


def sage_gcn_forward(src, nbr, w_self, w_agg, *, tile_n=128,
                     compute_dtype=jnp.bfloat16):
    """src: (N, D), nbr: (N, K, D), w_self: (D, H), w_agg: (D, H) -> (N, H) f32."""
    N, D = src.shape
    _, K, _ = nbr.shape
    H = w_self.shape[1]
    Dc = D + K * D

    # Fold the neighbor mean into the aggregator weight and fuse both matmuls:
    #   mean(nbr, 1) @ W_agg == nbr.reshape(N, K*D) @ tile(W_agg / K, (K, 1))
    w_agg_tiled = jnp.tile(w_agg.astype(jnp.float32) / K, (K, 1))        # (K*D, H)
    w_cat = jnp.concatenate([w_self, w_agg_tiled], axis=0)               # (Dc, H)
    x_cat = jnp.concatenate([src, nbr.reshape(N, K * D)], axis=1)        # (N, Dc)

    # bf16 inputs to the MXU (halves HBM/DMA bytes); accumulate stays f32.
    x_cat = x_cat.astype(compute_dtype)
    w_cat = w_cat.astype(compute_dtype)

    # Don't pad a tiny N all the way up to tile_n; keep tile a multiple of 16
    # (bf16 sublane packing) and >= 16.
    tile_n = max(16, min(tile_n, _round_up(N, 16)))
    n_blocks = pl.cdiv(N, tile_n)
    n_pad = n_blocks * tile_n
    if n_pad != N:
        x_cat = jnp.pad(x_cat, ((0, n_pad - N), (0, 0)))

    out = pl.pallas_call(
        sage_gcn_kernel,
        out_shape=jax.ShapeDtypeStruct((n_pad, H), jnp.float32),
        grid_spec=pltpu.PrefetchScalarGridSpec(
            num_scalar_prefetch=0,
            grid=(n_blocks,),
            in_specs=[
                pl.BlockSpec((tile_n, Dc), lambda i: (i, 0)),   # fused activations
                pl.BlockSpec((Dc, H), lambda i: (0, 0)),        # fused weight (resident)
            ],
            out_specs=pl.BlockSpec((tile_n, H), lambda i: (i, 0)),
        ),
        compiler_params=pltpu.CompilerParams(
            dimension_semantics=("parallel",)),
    )(x_cat, w_cat)

    return out[:N]


def kaiming_normal(key, shape):
    # PyTorch kaiming_normal_ (fan_in mode, leaky_relu a=0): std = sqrt(2 / fan_in);
    # for a 2-D tensor PyTorch uses dim-1 as fan_in.
    fan_in = shape[1]
    std = math.sqrt(2.0 / fan_in)
    return std * jax.random.normal(key, shape, dtype=jnp.float32)


def reference_forward(src, nbr, w_self, w_agg):
    # Plain-JAX f32 reference with the original module structure.
    neighbor_hidden = jnp.mean(nbr, axis=1) @ w_agg
    self_hidden = src @ w_self
    hidden = self_hidden + neighbor_hidden
    return jnp.where(hidden > 0, hidden, 0.01 * hidden)


if __name__ == "__main__":
    key = jax.random.PRNGKey(0)
    k_src, k_nbr, k_ws, k_wa = jax.random.split(key, 4)

    # nodes, neighbors-per-node, input_dim, hidden_dim
    # H multiple of 128 -> lane-dense output stores; N/tile_n = 2 grid blocks.
    N, K, D, H = 256, 4, 64, 128

    src = jax.random.normal(k_src, (N, D), dtype=jnp.float32)
    nbr = jax.random.normal(k_nbr, (N, K, D), dtype=jnp.float32)
    w_self = kaiming_normal(k_ws, (D, H))   # SageGcn.weight
    w_agg = kaiming_normal(k_wa, (D, H))    # NeighborAggregator.weight

    out = sage_gcn_forward(src, nbr, w_self, w_agg, tile_n=128)
    out = jax.block_until_ready(out)

    ref = reference_forward(src, nbr, w_self, w_agg)
    assert out.shape == (N, H)
    # bf16 MXU inputs vs f32 reference -> relaxed tolerance.
    assert jnp.allclose(out, ref, atol=1e-1, rtol=5e-2)

    print("KERNEL_OK")
</pallas_src>

<mosaic_0001>
module attributes {stable_mosaic.version = 11 : i64} {
  func.func @sage_gcn_kernel(%arg0: i32, %arg1: memref<128x320xbf16, #tpu.memory_space<vmem>>, %arg2: memref<320x128xbf16, #tpu.memory_space<vmem>>, %arg3: memref<128x128xf32, #tpu.memory_space<vmem>>) attributes {dimension_semantics = [#tpu.dimension_semantics<parallel>], iteration_bounds = array<i64: 2>, scalar_prefetch = 0 : i64, scratch_operands = 0 : i64, tpu.core_type = #tpu.core_type<tc>, window_params = [{transform_indices = @transform_0, window_bounds = array<i64: 128, 320>}, {pipeline_mode = #tpu.pipeline_mode<synchronous>, transform_indices = @transform_1, window_bounds = array<i64: 320, 128>}, {transform_indices = @transform_2, window_bounds = array<i64: 128, 128>}]} {
    %c0 = arith.constant 0 : index
    %c0_0 = arith.constant 0 : index
    %0 = vector.load %arg1[%c0, %c0_0] : memref<128x320xbf16, #tpu.memory_space<vmem>>, vector<128x320xbf16>
    %c0_1 = arith.constant 0 : index
    %c0_2 = arith.constant 0 : index
    %1 = vector.load %arg2[%c0_1, %c0_2] : memref<320x128xbf16, #tpu.memory_space<vmem>>, vector<320x128xbf16>
    %cst = arith.constant dense<0.000000e+00> : vector<128x128xf32>
    %2 = tpu.matmul %0, %1, %cst {dimension_numbers = #tpu.dot_dimension_numbers<[1], [0], [0], [1], [0, 0, 1, 1], [], []>} : vector<128x320xbf16>, vector<320x128xbf16>, vector<128x128xf32> -> vector<128x128xf32>
    %cst_3 = arith.constant 0.000000e+00 : f32
    %3 = vector.broadcast %cst_3 : f32 to vector<128x128xf32>
    %4 = arith.cmpf ogt, %2, %3 : vector<128x128xf32>
    %cst_4 = arith.constant 0.00999999977 : f32
    %5 = vector.broadcast %cst_4 : f32 to vector<128x128xf32>
    %6 = arith.mulf %5, %2 : vector<128x128xf32>
    %7 = arith.select %4, %2, %6 : vector<128x128xi1>, vector<128x128xf32>
    %c0_5 = arith.constant 0 : index
    %c0_6 = arith.constant 0 : index
    %8 = vector.load %arg3[%c0_5, %c0_6] : memref<128x128xf32, #tpu.memory_space<vmem>>, vector<128x128xf32>
    tpu.vector_store %arg3[%c0_5, %c0_6], %7 {strides = array<i32>} : memref<128x128xf32, #tpu.memory_space<vmem>>, vector<128x128xf32>,
    return
  }
  func.func @transform_0(%arg0: i32) -> (i32, i32) {
    %c0_i32 = arith.constant 0 : i32
    %c0_i32_0 = arith.constant 0 : i32
    return %arg0, %c0_i32 : i32, i32
  }
  func.func @transform_1(%arg0: i32) -> (i32, i32) {
    %c0_i32 = arith.constant 0 : i32
    %c0_i32_0 = arith.constant 0 : i32
    %c0_i32_1 = arith.constant 0 : i32
    return %c0_i32, %c0_i32_0 : i32, i32
  }
  func.func @transform_2(%arg0: i32) -> (i32, i32) {
    %c0_i32 = arith.constant 0 : i32
    %c0_i32_0 = arith.constant 0 : i32
    return %arg0, %c0_i32 : i32, i32
  }
}

</mosaic_0001>

<bundles_post_ra>
// kernel: tpu_custom_call.1
= control target key start
LH: loop header
LB: loop body
LE: loop exit
PB: predicated region body
PF: predicated region fallthrough
CT: control target
= control target key end

     0   :  { %7 = vsyncpa [#allocation3], 0  ;;  %s1417_s0 = inlined_call_operand.vmem [shape: bf16[256,320], index: 0, kind: input, shape index: {}]   ;;  %s1418_s1 = inlined_call_operand.vmem [shape: bf16[320,128], index: 1, kind: input, shape index: {}]   ;;  %s1419_s2 = inlined_call_operand.hbm [shape: f32[256,128], index: 2, kind: output, shape index: {}]  }
   0x1   :  { %9 = vsyncpa [#allocation3 + $0x1], 0  ;;  %s1175_s9 = smov 0   ;;  %s1177_s10 = smov 0  }
   0x2   :  { %s1179_s11 = smov 0   ;;  %s1181_s12 = smov 0  }
   0x3 LB: > { %s1196_s13 = sadd.s32 4294967295, %s1155_s12   ;;  %s820_s14 = sadd.s32 4294967294, %s1155_s12   ;;  %s1155_s12 = sphi %s1181_s12, %s1425_s12   ;;  %s1151_s11 = sphi %s1179_s11, %s1424_s11   ;;  %s1147_s10 = sphi %s1177_s10, %s1423_s10   ;;  %s1143_s9 = sphi %s1175_s9, %s1422_s9  }
   0x4   : > { %s1200_s15 = sadd.s32 1, %s1155_s12   ;;  %s69_s16 = sadd.s32 1, %s1151_s11 }
   0x5   : > { %s66_s17 = ssub.s32 %s1155_s12, %s1200_s15  ;;  %p79_p0 = scmp.ne.s32.totalorder %s1151_s11, %s1147_s10 }
   0x6   : > { %p67_p1 = scmp.eq.s32.totalorder %s66_s17, 0  ;;  %p80_p2 = scmp.eq.s32.totalorder %s1196_s13, 1 }
   0x7   : > { %p85_p3 = scmp.ne.s32.totalorder %s1147_s10, %s1143_s9  ;;  %p86_p4 = scmp.eq.s32.totalorder %s820_s14, 1 }
   0x8   : > { %s1211_s18 = scalar_select %p67_p1, %s1151_s11, %s69_s16  }
   0x9   : > { %p1213_p5 = por %p80_p2, %p79_p0  ;;  %p1217_p6 = por %p86_p4, %p85_p3 }
   0xa   : > { %p823_p7 = scmp.ge.s32.totalorder %s1155_s12, 1  ;;  %p117_p8 = scmp.lt.s32.totalorder %s1155_s12, 3 }
   0xc   : > { %p118_p9 = pnand %p823_p7, %p117_p8 }
   0xd   : > { %s825_s23 = sshll.u32 (!%p118_p9), %s1196_s13, 4  ;;  %s884_s3 = sshll.u32 (!%p118_p9), %s1196_s13, 11 }
   0xe   : > { %121 = sbr.rel (%p118_p9) target bundleno = 312 (0x138), region = 28  ;;  %p141_p10 = scmp.lt.s32.totalorder (!%p118_p9), %s825_s23, 31 }
   0xf   : > { %s1369_s7 = scalar_lea.hbm (!%p118_p9), %s1419_s2, %s884_s3  ;;  %s1157_s14 = smov (!%p118_p9), [#allocation2]  }
  0x10   : > { %s1099_s16 = sshll.u32 (!%p118_p9), %s1157_s14, 4  ;;  %s1100_s16 = int_to_ptr.vmem [resolvable:$false] %s1099_s16 }
  0x11   : > { %s1101_s17 = scalar_lea.vmem (!%p118_p9), %s1100_s16, 4096 }
  0x13   : > { %v1043_v0 = vld [vmem:[%s1418_s1 + $0x78] sm:$0xff]   ;;  %v1045_v2 = vld [vmem:[%s1418_s1 + $0x70] sm:$0xff]   ;;  %v1047_v4 = vld [vmem:[%s1418_s1 + $0x68] sm:$0xff]   ;;  %s1427_s23 = smov (!%p141_p10, %s825_s23), 31  ;;  %vm461_vm0 = vcmask 523264  }
  0x14   : > { %v1044_v1 = vld [vmem:[%s1418_s1 + $0x38] sm:$0xff]   ;;  %885 = vmatprep.subr.bf16.mxu0 %v1043_v0  ;;  %985 = vmatprep.subr.bf16.mxu1 %v1043_v0  ;;  %v1046_v3 = vld [vmem:[%s1418_s1 + $0x30] sm:$0xff]   ;;  %v1048_v5 = vld [vmem:[%s1418_s1 + $0x28] sm:$0xff]   ;;  %s1001_s8 = smul.u32 12, %s1427_s23 }
  0x15   : > { %886 = vmatpush3.bf16.msra.mxu0 %v1044_v1  ;;  %993 = vmatpush3.bf16.msra.mxu1 %v1044_v1  ;;  %v1049_v6 = vld [vmem:[%s1418_s1 + $0x60] sm:$0xff]   ;;  %v1051_v8 = vld [vmem:[%s1418_s1 + $0x58] sm:$0xff]   ;;  %v1053_v10 = vld [vmem:[%s1418_s1 + $0x50] sm:$0xff]  }
  0x16   : > { %887 = vmatprep.subr.bf16.mxu0 %v1045_v2  ;;  %986 = vmatprep.subr.bf16.mxu1 %v1045_v2  ;;  %v1050_v7 = vld [vmem:[%s1418_s1 + $0x20] sm:$0xff]   ;;  %s1254_s25 = scalar_lea.vmem %s1417_s0, %s1001_s8  ;;  %v1052_v9 = vld [vmem:[%s1418_s1 + $0x18] sm:$0xff]   ;;  %v1054_v13 = vld [vmem:[%s1418_s1 + $0x10] sm:$0xff]  }
  0x17   : > { %v1061_v11 = vld [vmem:[%s1254_s25 + $0x4] ss:$12 sps:$4 sm:$0xff]   ;;  %v1064_v12 = vld [vmem:[%s1254_s25 + $0x94] ss:$12 sps:$4 sm:$0xff]   ;;  %v1055_v14 = vld [vmem:[%s1418_s1 + $0x48] sm:$0xff]  }
  0x18   : > { %518 = vmatprep.mubr.bf16.mxu0 %v1061_v11  ;;  %566 = vmatprep.mubr.bf16.mxu1 %v1064_v12  ;;  %v1056_v15 = vld [vmem:[%s1418_s1 + $0x8] sm:$0xff]   ;;  %v1057_v16 = vld [vmem:[%s1418_s1 + $0x40] sm:$0xff]   ;;  %v1065_v18 = vld [vmem:[%s1418_s1 + $0x98] sm:$0xff]  }
  0x19   : > { %888 = vmatpush3.bf16.msra.mxu0 %v1046_v3  ;;  %994 = vmatpush3.bf16.msra.mxu1 %v1046_v3  ;;  %v1058_v17 = vld [vmem:[%s1418_s1] sm:$0xff]   ;;  %v1062_v20 = vld [vmem:[%s1254_s25 + $0x90] ss:$12 sps:$4 sm:$0xff]   ;;  %v1069_v23 = vld [vmem:[%s1254_s25 + $0xac] ss:$12 sps:$4 sm:$0xff]  }
  0x1a   : > { %889 = vmatprep.subr.bf16.mxu0 %v1047_v4  ;;  %987 = vmatprep.subr.bf16.mxu1 %v1047_v4  ;;  %v1059_v19 = vld [vmem:[%s1254_s25] ss:$12 sps:$4 sm:$0xff]   ;;  %v1066_v21 = vld [vmem:[%s1418_s1 + $0x90] sm:$0xff]   ;;  %v1067_v22 = vld [vmem:[%s1254_s25 + $0x1c] ss:$12 sps:$4 sm:$0xff]  }
  0x1b   : > { %v1073_v24 = vld [vmem:[%s1418_s1 + $0x88] sm:$0xff]   ;;  %v1071_v25 = vld [vmem:[%s1254_s25 + $0x18] ss:$12 sps:$4 sm:$0xff]   ;;  %v1075_v27 = vld [vmem:[%s1254_s25 + $0x34] ss:$12 sps:$4 sm:$0xff]  }
  0x1c   : > { %v1072_v26 = vld [vmem:[%s1254_s25 + $0xa8] ss:$12 sps:$4 sm:$0xff]   ;;  %v1074_v28 = vld [vmem:[%s1418_s1 + $0x80] sm:$0xff]   ;;  %v1078_v30 = vld [vmem:[%s1254_s25 + $0x30] ss:$12 sps:$4 sm:$0xff]  }
  0x1d   : > { %890 = vmatpush3.bf16.msra.mxu0 %v1048_v5  ;;  %995 = vmatpush3.bf16.msra.mxu1 %v1048_v5  ;;  %v1077_v29 = vld [vmem:[%s1254_s25 + $0x8] ss:$12 sps:$4 sm:$0xff]   ;;  %v1079_v31 = vld [vmem:[%s1254_s25 + $0x20] ss:$12 sps:$4 sm:$0xff]   ;;  %v1082_v33 = vld [vmem:[%s1254_s25 + $0x38] ss:$12 sps:$4 sm:$0xff]  }
  0x1e   : > { %891 = vmatprep.subr.bf16.mxu0 %v1049_v6  ;;  %988 = vmatprep.subr.bf16.mxu1 %v1049_v6  ;;  %v1080_v32 = vld [vmem:[%s1254_s25 + $0x4c] ss:$12 sps:$4 sm:$0xff]   ;;  %v1083_v34 = vld [vmem:[%s1254_s25 + $0x48] ss:$12 sps:$4 sm:$0xff]   ;;  %v1084_v35 = vld [vmem:[%s1254_s25 + $0x50] ss:$12 sps:$4 sm:$0xff]  }
  0x1f   : > { %v1085_v36 = vld [vmem:[%s1254_s25 + $0x64] ss:$12 sps:$4 sm:$0xff]   ;;  %v1087_v37 = vld [vmem:[%s1254_s25 + $0x68] ss:$12 sps:$4 sm:$0xff]   ;;  %v1088_v38 = vld [vmem:[%s1254_s25 + $0x60] ss:$12 sps:$4 sm:$0xff]  }
  0x20   : > { %v1089_v39 = vld [vmem:[%s1254_s25 + $0x80] ss:$12 sps:$4 sm:$0xff]   ;;  %v1090_v40 = vld [vmem:[%s1254_s25 + $0x7c] ss:$12 sps:$4 sm:$0xff]   ;;  %v1092_v41 = vld [vmem:[%s1254_s25 + $0x98] ss:$12 sps:$4 sm:$0xff]  }
  0x21   : > { %892 = vmatpush3.bf16.msra.mxu0 %v1050_v7  ;;  %996 = vmatpush3.bf16.msra.mxu1 %v1050_v7  ;;  %v1093_v42 = vld [vmem:[%s1254_s25 + $0x78] ss:$12 sps:$4 sm:$0xff]   ;;  %v1094_v43 = vld [vmem:[%s1254_s25 + $0xb0] ss:$12 sps:$4 sm:$0xff]   ;;  %s137_s25 = sand.u32 1, %s1147_s10  }
  0x22   : > { %893 = vmatprep.subr.bf16.mxu0 %v1051_v8  ;;  %989 = vmatprep.subr.bf16.mxu1 %v1051_v8  ;;  %s824_s29 = sshll.u32 %s137_s25, 7  ;;  %s1377_s13 = scalar_lea.sflag [#allocation3], %s137_s25 }
  0x23   : > { %s1340_s30 = scalar_lea.vmem [#allocation2], %s824_s29 }
  0x24   : > { %s758_s4 = sshll.u32 %s1340_s30, 4  ;;  %s1371_s4 = int_to_ptr.vmem [resolvable:$true] %s758_s4 }
  0x25   : > { %894 = vmatpush3.bf16.msra.mxu0 %v1052_v9  ;;  %997 = vmatpush3.bf16.msra.mxu1 %v1052_v9  ;;  %s1095_s8 = scalar_lea.vmem %s1371_s4, 2048  ;;  %p1102_p0 = scmp.lt.s32.totalorder %s1371_s4, %s1100_s16 }
  0x26   : > { %895 = vmatprep.subr.bf16.mxu0 %v1053_v10  ;;  %990 = vmatprep.subr.bf16.mxu1 %v1053_v10  ;;  %p1096_p11 = scmp.ne.s32.totalorder %s1371_s4, %s1095_s8  ;;  %p1103_p1 = scmp.lt.s32.totalorder %s1101_s17, %s1095_s8 }
  0x28   : > { %p1097_p12 = pnand %p1096_p11, %p1213_p5  ;;  %p1104_p2 = por %p1103_p1, %p1102_p0 }
  0x29   : > { %896 = vmatpush3.bf16.msra.mxu0 %v1054_v13  ;;  %998 = vmatpush3.bf16.msra.mxu1 %v1054_v13 }
  0x2a   : > { %897 = vmatprep.subr.bf16.mxu0 %v1055_v14  ;;  %991 = vmatprep.subr.bf16.mxu1 %v1055_v14  ;;  %p1098_p13 = pneg %p1097_p12 }
  0x2c   : > { %p1105_p3 = pnand %p1104_p2, %p1098_p13 }
  0x2d   : > { %898 = vmatpush3.bf16.msra.mxu0 %v1056_v15  ;;  %999 = vmatpush3.bf16.msra.mxu1 %v1056_v15 }
  0x2e   : > { %899 = vmatprep.subr.bf16.mxu0 %v1057_v16  ;;  %992 = vmatprep.subr.bf16.mxu1 %v1057_v16 }
  0x31   : > { %900 = vmatpush3.bf16.msra.mxu0 %v1058_v17  ;;  %1000 = vmatpush3.bf16.msra.mxu1 %v1058_v17 }
  0x32   : > { %961 = vmatprep.subr.bf16.mxu1 %v1065_v18 }
  0x34   : > { %519 = vmatmul.mubr.bf16.vlgmr.msra.gmra.mxu0 %v1059_v19  ;;  %567 = vmatmul.mubr.bf16.vlgmr.msra.gmra.mxu1 %v1062_v20 }
  0x35   : > { %962 = vmatpush3.bf16.msra.mxu1 %v1065_v18  ;;  %526 = vmatprep.mubr.bf16.mxu0 %v1067_v22 }
  0x36   : > { %963 = vmatprep.subr.bf16.mxu1 %v1066_v21  ;;  %574 = vmatprep.mubr.bf16.mxu1 %v1069_v23 }
  0x39   : > { %964 = vmatpush3.bf16.msra.mxu1 %v1066_v21 }
  0x3a   : > { %965 = vmatprep.subr.bf16.mxu1 %v1073_v24 }
  0x3c   : > { %527 = vmatmul.mubr.bf16.gmra.mxu0 %v1071_v25  ;;  %575 = vmatmul.mubr.bf16.gmra.mxu1 %v1072_v26 }
  0x3d   : > { %966 = vmatpush3.bf16.msra.mxu1 %v1073_v24  ;;  %534 = vmatprep.mubr.bf16.mxu0 %v1075_v27 }
  0x3e   : > { %967 = vmatprep.subr.bf16.mxu1 %v1074_v28  ;;  %969 = vmatprep.mubr.msk.bf16.mxu1 %vm461_vm0, %v1077_v29 }
  0x41   : > { %968 = vmatpush3.bf16.msra.mxu1 %v1074_v28 }
  0x44   : > { %535 = vmatmul.mubr.bf16.gmra.mxu0 %v1078_v30  ;;  %970 = vmatmul.mubr.msk.bf16.vlgmr.msra.gmra.mxu1 %vm461_vm0, %v1079_v31 }
  0x45   : > { %542 = vmatprep.mubr.bf16.mxu0 %v1080_v32  ;;  %973 = vmatprep.mubr.msk.bf16.mxu1 %vm461_vm0, %v1082_v33 }
  0x4c   : > { %543 = vmatmul.mubr.bf16.gmra.mxu0 %v1083_v34  ;;  %974 = vmatmul.mubr.msk.bf16.gmra.mxu1 %vm461_vm0, %v1084_v35 }
  0x4d   : > { %550 = vmatprep.mubr.bf16.mxu0 %v1085_v36  ;;  %977 = vmatprep.mubr.msk.bf16.mxu1 %vm461_vm0, %v1087_v37 }
  0x54   : > { %551 = vmatmul.mubr.bf16.gmra.mxu0 %v1088_v38  ;;  %978 = vmatmul.mubr.msk.bf16.gmra.mxu1 %vm461_vm0, %v1089_v39 }
  0x55   : > { %558 = vmatprep.mubr.bf16.mxu0 %v1090_v40  ;;  %981 = vmatprep.mubr.msk.bf16.mxu1 %vm461_vm0, %v1092_v41 }
  0x5c   : > { %559 = vmatmul.mubr.bf16.gmra.mxu0 %v1093_v42  ;;  %982 = vmatmul.mubr.msk.bf16.gmra.mxu1 %vm461_vm0, %v1094_v43 }
  0xf4   : > { %v901_v44 = vpop.f32.mrf.mxu0  ;;  %v1321_v45 = vpop.f32.mrf.mxu1 }
  0xf6   : > { %v902_v46 = vpop.f32.mrf.mxu0  ;;  %v1323_v47 = vpop.f32.mrf.mxu1 }
  0xf7   : > { %v903_v63 = vadd.f32 %v902_v46, %v901_v44 }
  0xf8   : > { %v904_v48 = vpop.f32.mrf.mxu0  ;;  %v1325_v49 = vpop.f32.mrf.mxu1 }
  0xfa   : > { %v905_v50 = vpop.f32.mrf.mxu0  ;;  %v1327_v51 = vpop.f32.mrf.mxu1 }
  0xfb   : > { %v906_v11 = vadd.f32 %v905_v50, %v904_v48 }
  0xfc   : > { %v907_v52 = vpop.f32.mrf.mxu0  ;;  %v1329_v53 = vpop.f32.mrf.mxu1 }
  0xfe   : > { %v908_v54 = vpop.f32.mrf.mxu0  ;;  %v1331_v55 = vpop.f32.mrf.mxu1 }
  0xff   : > { %v909_v60 = vadd.f32 %v908_v54, %v907_v52 }
 0x100   : > { %v910_v56 = vpop.f32.mrf.mxu0  ;;  %v1333_v57 = vpop.f32.mrf.mxu1 }
 0x102   : > { %v911_v58 = vpop.f32.mrf.mxu0  ;;  %v1336_v59 = vpop.f32.mrf.mxu1 }
 0x103   : > { %v912_v3 = vadd.f32 %v911_v58, %v910_v56 }
 0x104   : > { %v913_v61 = vpop.f32.mrf.mxu0  ;;  %v971_v62 = vpop.f32.mrf.mxu1 }
 0x105   : > { %v626_v0 = vadd.f32 %v971_v62, %v909_v60  ;;  %v945_v62 = vadd.f32 %v1331_v55, %v1329_v53 }
 0x106   : > { %v914_v1 = vpop.f32.mrf.mxu0  ;;  %v617_v2 = vpop.f32.mrf.mxu1 }
 0x107   : > { %vm682_vm1 = vcmp.gt.f32.partialorder %v626_v0, 0.0  ;;  %v698_v4 = vmul.f32 0.01, %v626_v0  ;;  %v618_v5 = vadd.f32 %v903_v63, %v617_v2  ;;  %v915_v19 = vadd.f32 %v914_v1, %v913_v61 }
 0x108   : > { %v916_v6 = vpop.f32.mrf.mxu0  ;;  %v972_v7 = vpop.f32.mrf.mxu1 }
 0x109   : > { %v714_v8 = vsel %vm682_vm1, %v626_v0, %v698_v4  ;;  %vm680_vm2 = vcmp.gt.f32.partialorder %v618_v5, 0.0  ;;  %v696_v9 = vmul.f32 0.01, %v618_v5  ;;  %v629_v10 = vadd.f32 %v972_v7, %v912_v3 }
 0x10a   : > { %730 = vst [vmem:[%s1340_s30 + $0x10] sm:$0xff] %v714_v8  ;;  %v917_v12 = vpop.f32.mrf.mxu0  ;;  %v620_v13 = vpop.f32.mrf.mxu1  ;;  %v948_v7 = vadd.f32 %v1336_v59, %v1333_v57 }
 0x10b   : > { %v712_v14 = vsel %vm680_vm2, %v618_v5, %v696_v9  ;;  %vm683_vm3 = vcmp.gt.f32.partialorder %v629_v10, 0.0  ;;  %v699_v15 = vmul.f32 0.01, %v629_v10  ;;  %v621_v16 = vadd.f32 %v906_v11, %v620_v13 }
 0x10c   : > { %728 = vst [vmem:[%s1340_s30] sm:$0xff] %v712_v14  ;;  %v919_v17 = vpop.f32.mrf.mxu0  ;;  %v975_v18 = vpop.f32.mrf.mxu1  ;;  %v918_v31 = vadd.f32 %v917_v12, %v916_v6  ;;  %v939_v6 = vadd.f32 %v1323_v47, %v1321_v45  ;;  %v942_v14 = vadd.f32 %v1327_v51, %v1325_v49 }
 0x10d   : > { %v715_v20 = vsel %vm683_vm3, %v629_v10, %v699_v15  ;;  %vm681_vm4 = vcmp.gt.f32.partialorder %v621_v16, 0.0  ;;  %v697_v21 = vmul.f32 0.01, %v621_v16 }
 0x10e   : > { %731 = vst [vmem:[%s1340_s30 + $0x18] sm:$0xff] %v715_v20  ;;  %v920_v22 = vpop.f32.mrf.mxu0  ;;  %v633_v23 = vpop.f32.mrf.mxu1 }
 0x10f   : > { %v921_v24 = vadd.f32 %v920_v22, %v919_v17  ;;  %v634_v25 = vadd.f32 %v915_v19, %v633_v23  ;;  %v713_v26 = vsel %vm681_vm4, %v621_v16, %v697_v21 }
 0x110   : > { %v922_v27 = vpop.f32.mrf.mxu0  ;;  %v976_v28 = vpop.f32.mrf.mxu1  ;;  %729 = vst [vmem:[%s1340_s30 + $0x8] sm:$0xff] %v713_v26 }
 0x111   : > { %v642_v29 = vadd.f32 %v975_v18, %v921_v24  ;;  %vm684_vm5 = vcmp.gt.f32.partialorder %v634_v25, 0.0  ;;  %v700_v30 = vmul.f32 0.01, %v634_v25 }
 0x112   : > { %v923_v32 = vpop.f32.mrf.mxu0  ;;  %v636_v33 = vpop.f32.mrf.mxu1 }
 0x113   : > { %vm686_vm6 = vcmp.gt.f32.partialorder %v642_v29, 0.0  ;;  %v702_v34 = vmul.f32 0.01, %v642_v29  ;;  %v716_v35 = vsel %vm684_vm5, %v634_v25, %v700_v30  ;;  %v924_v36 = vadd.f32 %v923_v32, %v922_v27 }
 0x114   : > { %732 = vst [vmem:[%s1340_s30 + $0x20] sm:$0xff] %v716_v35  ;;  %v637_v37 = vadd.f32 %v918_v31, %v636_v33  ;;  %v925_v38 = vpop.f32.mrf.mxu0  ;;  %v979_v39 = vpop.f32.mrf.mxu1 }
 0x115   : > { %v718_v40 = vsel %vm686_vm6, %v642_v29, %v702_v34  ;;  %v645_v41 = vadd.f32 %v976_v28, %v924_v36 }
 0x116   : > { %734 = vst [vmem:[%s1340_s30 + $0x30] sm:$0xff] %v718_v40  ;;  %vm685_vm7 = vcmp.gt.f32.partialorder %v637_v37, 0.0  ;;  %v701_v42 = vmul.f32 0.01, %v637_v37  ;;  %v926_v43 = vpop.f32.mrf.mxu0  ;;  %v649_v44 = vpop.f32.mrf.mxu1 }
 0x117   : > { %vm687_vm8 = vcmp.gt.f32.partialorder %v645_v41, 0.0  ;;  %v703_v46 = vmul.f32 0.01, %v645_v41  ;;  %v927_v48 = vadd.f32 %v926_v43, %v925_v38 }
 0x118   : > { %v717_v50 = vsel %vm685_vm7, %v637_v37, %v701_v42  ;;  %v928_v52 = vpop.f32.mrf.mxu0  ;;  %v980_v54 = vpop.f32.mrf.mxu1 }
 0x119   : > { %v719_v56 = vsel %vm687_vm8, %v645_v41, %v703_v46  ;;  %733 = vst [vmem:[%s1340_s30 + $0x28] sm:$0xff] %v717_v50  ;;  %v650_v58 = vadd.f32 %v927_v48, %v649_v44 }
 0x11a   : > { %735 = vst [vmem:[%s1340_s30 + $0x38] sm:$0xff] %v719_v56  ;;  %v929_v60 = vpop.f32.mrf.mxu0  ;;  %v652_v61 = vpop.f32.mrf.mxu1 }
 0x11b   : > { %vm688_vm9 = vcmp.gt.f32.partialorder %v650_v58, 0.0  ;;  %v704_v63 = vmul.f32 0.01, %v650_v58  ;;  %v930_v0 = vadd.f32 %v929_v60, %v928_v52 }
 0x11c   : > { %v931_v1 = vpop.f32.mrf.mxu0  ;;  %v983_v2 = vpop.f32.mrf.mxu1 }
 0x11d   : > { %v720_v3 = vsel %vm688_vm9, %v650_v58, %v704_v63  ;;  %v653_v4 = vadd.f32 %v930_v0, %v652_v61  ;;  %v674_v5 = vadd.f32 %v983_v2, %v945_v62 }
 0x11e   : > { %736 = vst [vmem:[%s1340_s30 + $0x40] sm:$0xff] %v720_v3  ;;  %v932_v8 = vpop.f32.mrf.mxu0  ;;  %v665_v9 = vpop.f32.mrf.mxu1 }
 0x11f   : > { %vm689_vm10 = vcmp.gt.f32.partialorder %v653_v4, 0.0  ;;  %v705_v53 = vmul.f32 0.01, %v653_v4  ;;  %vm694_vm11 = vcmp.gt.f32.partialorder %v674_v5, 0.0  ;;  %v710_v55 = vmul.f32 0.01, %v674_v5 }
 0x120   : > { %v933_v10 = vadd.f32 %v932_v8, %v931_v1  ;;  %v666_v11 = vadd.f32 %v939_v6, %v665_v9  ;;  %v934_v12 = vpop.f32.mrf.mxu0  ;;  %v984_v13 = vpop.f32.mrf.mxu1 }
 0x121   : > { %v721_v45 = vsel %vm689_vm10, %v653_v4, %v705_v53  ;;  %v726_v47 = vsel %vm694_vm11, %v674_v5, %v710_v55  ;;  %v677_v57 = vadd.f32 %v984_v13, %v948_v7 }
 0x122   : > { %737 = vst [vmem:[%s1340_s30 + $0x48] sm:$0xff] %v721_v45  ;;  %742 = vst [vmem:[%s1340_s30 + $0x70] sm:$0xff] %v726_v47  ;;  %v658_v59 = vadd.f32 %v979_v39, %v933_v10  ;;  %vm692_vm12 = vcmp.gt.f32.partialorder %v666_v11, 0.0  ;;  %v708_v15 = vmul.f32 0.01, %v666_v11  ;;  %v935_v16 = vpop.f32.mrf.mxu0  ;;  %v668_v17 = vpop.f32.mrf.mxu1 }
 0x123   : > { %vm695_vm13 = vcmp.gt.f32.partialorder %v677_v57, 0.0  ;;  %v711_v18 = vmul.f32 0.01, %v677_v57  ;;  %v936_v19 = vadd.f32 %v935_v16, %v934_v12  ;;  %v669_v20 = vadd.f32 %v942_v14, %v668_v17 }
 0x124   : > { %vm690_vm14 = vcmp.gt.f32.partialorder %v658_v59, 0.0  ;;  %v706_v49 = vmul.f32 0.01, %v658_v59  ;;  %v724_v51 = vsel %vm692_vm12, %v666_v11, %v708_v15 }
 0x125   : > { %740 = vst [vmem:[%s1340_s30 + $0x60] sm:$0xff] %v724_v51  ;;  %v727_v21 = vsel %vm695_vm13, %v677_v57, %v711_v18  ;;  %v661_v22 = vadd.f32 %v980_v54, %v936_v19  ;;  %vm693_vm15 = vcmp.gt.f32.partialorder %v669_v20, 0.0  ;;  %v709_v23 = vmul.f32 0.01, %v669_v20 }
 0x126   : > { %v722_v24 = vsel %vm690_vm14, %v658_v59, %v706_v49  ;;  %743 = vst [vmem:[%s1340_s30 + $0x78] sm:$0xff] %v727_v21 }
 0x127   : > { %738 = vst [vmem:[%s1340_s30 + $0x50] sm:$0xff] %v722_v24  ;;  %vm691_vm0 = vcmp.gt.f32.partialorder %v661_v22, 0.0  ;;  %v707_v25 = vmul.f32 0.01, %v661_v22  ;;  %v725_v26 = vsel %vm693_vm15, %v669_v20, %v709_v23 }
 0x128   : > { %741 = vst [vmem:[%s1340_s30 + $0x68] sm:$0xff] %v725_v26 }
 0x129   : > { %v723_v27 = vsel %vm691_vm0, %v661_v22, %v707_v25 }
 0x12a   : > { %739 = vst [vmem:[%s1340_s30 + $0x58] sm:$0xff] %v723_v27 }
 0x12b   : > { %1108 = shalt.err (!%p1105_p3)
}
 0x12c   : > { %s1109_s21 = scalar_lea.hbm %s1369_s7, 2048  ;;  %s1113_s23 = scalar_lea.hbm %s1419_s2, 4096 }
 0x12d   : > { %p1110_p4 = scmp.ne.s32.totalorder %s1369_s7, %s1109_s21  ;;  %p1114_p9 = scmp.lt.s32.totalorder %s1369_s7, %s1419_s2 }
 0x12e   : > { %p1115_p10 = scmp.lt.s32.totalorder %s1113_s23, %s1109_s21 }
 0x12f   : > { %p1111_p7 = pnand %p1110_p4, %p1213_p5 }
 0x130   : > { %p1116_p11 = por %p1115_p10, %p1114_p9 }
 0x131   : > { %p1112_p8 = pneg %p1111_p7 }
 0x133   : > { %p1117_p12 = pnand %p1116_p11, %p1112_p8 }
 0x135   : > { %1120 = shalt.err (!%p1117_p12)
}
 0x136   : > { %s1158_s28 = smov 128   ;;  %s1159_s25 = smov 8  }
 0x137   : > { %1002 = dma.vmem_to_hbm [thread:$0]  (%p1213_p5), %s1371_s4, 2048, %s1369_s7, %s1377_s13, %s1158_s28, %s1158_s28, %s1159_s25  }
 0x138 PF: > { %p1008_p13 = scmp.ge.s32.totalorder %s1155_s12, 2  ;;  %s773_s29 = sand.u32 1, %s1143_s9  }
 0x139   : > { %s774_s30 = scalar_lea.sflag [#allocation3], %s773_s29 }
 0x13a   : > { %p1005_p0 = pnand %p1008_p13, %p1217_p6 }
 0x13c   : > { %p1006_p1 = pneg %p1005_p0 }
 0x13e   : > { %1138 = dma.done.wait (%p1006_p1), %s774_s30, 2048  }
 0x13f   : > { %1140 = vsyncadd (%p1006_p1), %s774_s30, 4294965248  ;;  %p12_p2 = scmp.ge.s32.totalorder %s1200_s15, 4   ;;  %s1422_s9 = smov %s1147_s10 }
 0x140   : > { %s1423_s10 = smov %s1151_s11  ;;  %s1424_s11 = smov %s1211_s18 }
 0x141   : > { %s1425_s12 = smov %s1200_s15  ;;  %14 = sbr.rel (!%p12_p2) target bundleno = 3 (0x3), region = 63 }
 0x146   :  { %779 = vsyncpa [#allocation3], 1 }
 0x147   :  { %781 = vsyncpa [#allocation3 + $0x1], 1 }

</bundles_post_ra>
